<compile_context>
chip_gen: v7x
topology: tpu7x:2x2x1
jax: 0.10.0
libtpu: 0.0.40
codegen_flags: <defaults>
</compile_context>

<pallas_src>
import jax
import jax.numpy as jnp
from jax.experimental import pallas as pl
from jax.experimental.pallas import tpu as pltpu


def _round_up(x, m):
    return (x + m - 1) // m * m


# ---------------------------------------------------------------------------
# Kernel
# ---------------------------------------------------------------------------
def _proj_head_kernel(x_ref, w1_ref, b1_ref, w2_ref, b2_ref, o_ref):
    # x_ref : (TB, F)  batch tile of the input
    # w1_ref: (F, H)   resident first-layer weight
    # b1_ref: (1, H)   first-layer bias
    # w2_ref: (H, D)   resident second-layer weight
    # b2_ref: (1, D)   second-layer bias
    # o_ref : (TB, D)  output tile
    x = x_ref[...]
    h = jnp.dot(x, w1_ref[...], preferred_element_type=jnp.float32)
    h = jnp.maximum(h + b1_ref[...], 0.0)                      # bias + ReLU in f32
    # TODO(synk): for very large H on v7x (64 MiB VMEM/TC), chunk the hidden dim with
    # lax.fori_loop and an f32 accumulator to bound the live (TB, H) intermediate.
    out = jnp.dot(h.astype(w2_ref.dtype), w2_ref[...],
                  preferred_element_type=jnp.float32) + b2_ref[...]
    o_ref[...] = out.astype(o_ref.dtype)


# ---------------------------------------------------------------------------
# One-time parameter preparation (hoisted out of the per-call path)
# ---------------------------------------------------------------------------
def prepare_params(w1, b1, w2, b2, dtype=None):
    """Reshape biases to (1, N) rows once and optionally cast params (e.g. to
    jnp.bfloat16) for MXU throughput / half the resident VMEM.  No padding is
    done: full-extent block dims are legal for the weight operands."""
    F, H = w1.shape
    H2, D = w2.shape
    assert H2 == H and b1.shape == (H,) and b2.shape == (D,)
    if dtype is not None:
        w1, b1, w2, b2 = (a.astype(dtype) for a in (w1, b1, w2, b2))
    return w1, b1.reshape(1, H), w2, b2.reshape(1, D)


# ---------------------------------------------------------------------------
# Tiling / VMEM heuristics
# ---------------------------------------------------------------------------
def _pick_tb(batch):
    """Rows per batch tile.

    Small batches: a single sublane-aligned tile (nothing worth pipelining).
    Large batches: 256-aligned tiles (fills the 256x256 MXU on v6e/v7x), up to
    1024 rows (HBM-roofline sweet spot on single-TC v5e/v6e), preferring an even
    number of grid steps so v7x's two TensorCores split the 'parallel' axis,
    while keeping batch padding small.
    """
    b8 = _round_up(max(batch, 8), 8)
    if b8 <= 1024:
        return b8
    for tb in (1024, 768, 512, 256):          # largest MXU-aligned tile first
        n = pl.cdiv(b8, tb)
        if n % 2 == 0 and n * tb - b8 <= b8 // 8:
            return tb                          # even grid, little padding
    return 512                                 # fallback: 512-row MXU-aligned tiles


def _vmem_tile_bytes(rows, cols, dtype):
    """VMEM footprint of a (rows, cols) buffer after (8, 128) layout padding."""
    return _round_up(rows, 8) * _round_up(cols, 128) * jnp.dtype(dtype).itemsize


def _vmem_limit_bytes(tb, F, H, D, x_dtype, w_dtype, out_dtype):
    weights = (_vmem_tile_bytes(F, H, w_dtype) + _vmem_tile_bytes(1, H, w_dtype)
               + _vmem_tile_bytes(H, D, w_dtype) + _vmem_tile_bytes(1, D, w_dtype))
    est = (2 * weights                                  # (double-buffered) resident weights
           + 2 * _vmem_tile_bytes(tb, F, x_dtype)       # pipelined input tiles
           + 2 * _vmem_tile_bytes(tb, D, out_dtype)     # pipelined output tiles
           + _vmem_tile_bytes(tb, H, jnp.float32)       # live f32 hidden intermediate
           + _vmem_tile_bytes(tb, D, jnp.float32)       # live f32 output intermediate
           + (2 << 20))                                 # headroom
    try:
        physical = pltpu.get_tpu_info().vmem_capacity_bytes
    except Exception:                                   # older JAX / no query: assume v7x floor
        physical = 64 << 20
    if est > physical:
        # Explicit budget check: on v7x (64 MiB / TC) a weight set that fits v5e/v6e
        # may not be residable at all.
        raise ValueError(
            f"ProjHead resident-weight kernel needs ~{est >> 20} MiB VMEM but this "
            f"TensorCore has {physical >> 20} MiB. Cast params with "
            "prepare_params(..., dtype=jnp.bfloat16), shrink tb, or use a hidden-dim "
            "reduction variant.")
    return min(max(est, 32 << 20), physical)


# ---------------------------------------------------------------------------
# Wrapper
# ---------------------------------------------------------------------------
def proj_head(feat, params, *, tb=None):
    """Fused projection head: relu(feat @ W1 + b1) @ W2 + b2.

    `params` is the tuple returned by `prepare_params` (prepared once)."""
    w1, b1, w2, b2 = params
    B, F = feat.shape
    Fw, H = w1.shape
    Hw, D = w2.shape
    assert Fw == F and Hw == H and b1.shape == (1, H) and b2.shape == (1, D)
    out_dtype = feat.dtype

    if tb is None:
        tb = _pick_tb(B)
    tb = min(_round_up(tb, 8), _round_up(B, 8))
    Bp = _round_up(B, tb)

    # No feature / hidden / head-dim padding.  Only the batch is (rarely) padded to a
    # whole tile; the padded rows are sliced back off below.
    x = feat if Bp == B else jnp.pad(feat, ((0, Bp - B), (0, 0)))

    grid = (Bp // tb,)

    cost = pl.CostEstimate(
        flops=2 * B * F * H + 2 * B * H * D,
        transcendentals=0,
        bytes_accessed=(feat.size * feat.dtype.itemsize
                        + w1.size * w1.dtype.itemsize + b1.size * b1.dtype.itemsize
                        + w2.size * w2.dtype.itemsize + b2.size * b2.dtype.itemsize
                        + B * D * jnp.dtype(out_dtype).itemsize),
    )

    out = pl.pallas_call(
        _proj_head_kernel,
        out_shape=jax.ShapeDtypeStruct((Bp, D), out_dtype),
        grid_spec=pltpu.PrefetchScalarGridSpec(
            num_scalar_prefetch=0,
            grid=grid,
            in_specs=[
                pl.BlockSpec((tb, F), lambda i: (i, 0)),   # batch-tiled input (pipelined)
                pl.BlockSpec((F, H), lambda i: (0, 0)),    # resident W1
                pl.BlockSpec((1, H), lambda i: (0, 0)),    # resident b1
                pl.BlockSpec((H, D), lambda i: (0, 0)),    # resident W2
                pl.BlockSpec((1, D), lambda i: (0, 0)),    # resident b2
            ],
            out_specs=pl.BlockSpec((tb, D), lambda i: (i, 0)),
        ),
        compiler_params=pltpu.CompilerParams(
            dimension_semantics=("parallel",),
            vmem_limit_bytes=_vmem_limit_bytes(tb, F, H, D, feat.dtype, w1.dtype,
                                               out_dtype),
        ),
        cost_estimate=cost,
    )(x, w1, b1, w2, b2)

    return out if Bp == B else out[:B]


def init_params(key, feat_dim, hidden_dim, head_dim):
    """Deterministic PyTorch-style (uniform +/- 1/sqrt(fan_in)) init."""
    k1, k2, k3, k4 = jax.random.split(key, 4)
    bound1 = 1.0 / (feat_dim ** 0.5)
    bound2 = 1.0 / (hidden_dim ** 0.5)
    w1 = jax.random.uniform(k1, (feat_dim, hidden_dim), jnp.float32, -bound1, bound1)
    b1 = jax.random.uniform(k2, (hidden_dim,), jnp.float32, -bound1, bound1)
    w2 = jax.random.uniform(k3, (hidden_dim, head_dim), jnp.float32, -bound2, bound2)
    b2 = jax.random.uniform(k4, (head_dim,), jnp.float32, -bound2, bound2)
    return w1, b1, w2, b2


if __name__ == "__main__":
    key = jax.random.PRNGKey(0)
    feat_dim, hidden_dim, head_dim = 32, 64, 16

    kp, kx1, kx2, kx3 = jax.random.split(key, 4)
    w1, b1, w2, b2 = init_params(kp, feat_dim, hidden_dim, head_dim)
    params = prepare_params(w1, b1, w2, b2)          # one-time prep (hoisted)

    def ref_fn(x):
        return jnp.maximum(x @ w1 + b1, 0.0) @ w2 + b2

    proj = jax.jit(proj_head)

    # 1) Small batch, single tile.
    feat = jax.random.normal(kx1, (8, feat_dim), jnp.float32)
    out = jax.block_until_ready(proj(feat, params))
    assert out.shape == (8, head_dim)
    assert jnp.allclose(out, ref_fn(feat), atol=1e-5, rtol=1e-5)

    # 2) Non-sublane-aligned batch (exercises the batch pad + slice path).
    feat2 = jax.random.normal(kx2, (100, feat_dim), jnp.float32)
    out2 = jax.block_until_ready(proj(feat2, params))
    assert out2.shape == (100, head_dim)
    assert jnp.allclose(out2, ref_fn(feat2), atol=1e-5, rtol=1e-5)

    # 3) Large batch: multi-step, MXU-aligned, even-length grid (2 x 1024 rows).
    feat3 = jax.random.normal(kx3, (2048, feat_dim), jnp.float32)
    out3 = jax.block_until_ready(proj(feat3, params))
    assert out3.shape == (2048, head_dim)
    assert jnp.allclose(out3, ref_fn(feat3), atol=1e-5, rtol=1e-5)

    # 4) Optional bf16 operands (f32 MXU accumulation) — throughput / VMEM knob.
    params_bf16 = prepare_params(w1, b1, w2, b2, dtype=jnp.bfloat16)
    out4 = jax.block_until_ready(proj(feat.astype(jnp.bfloat16), params_bf16))
    assert out4.shape == (8, head_dim) and out4.dtype == jnp.bfloat16
    assert jnp.allclose(out4.astype(jnp.float32), ref_fn(feat), atol=0.3, rtol=0.3)

    print("KERNEL_OK")
</pallas_src>

<mosaic_0001>
module attributes {stable_mosaic.version = 11 : i64} {
  func.func @_proj_head_kernel(%arg0: i32, %arg1: memref<8x32xf32, #tpu.memory_space<vmem>>, %arg2: memref<32x64xf32, #tpu.memory_space<vmem>>, %arg3: memref<1x64xf32, #tpu.memory_space<vmem>>, %arg4: memref<64x16xf32, #tpu.memory_space<vmem>>, %arg5: memref<1x16xf32, #tpu.memory_space<vmem>>, %arg6: memref<8x16xf32, #tpu.memory_space<vmem>>) attributes {dimension_semantics = [#tpu.dimension_semantics<parallel>], iteration_bounds = array<i64: 1>, scalar_prefetch = 0 : i64, scratch_operands = 0 : i64, tpu.core_type = #tpu.core_type<tc>, window_params = [{transform_indices = @transform_0, window_bounds = array<i64: 8, 32>}, {pipeline_mode = #tpu.pipeline_mode<synchronous>, transform_indices = @transform_1, window_bounds = array<i64: 32, 64>}, {pipeline_mode = #tpu.pipeline_mode<synchronous>, transform_indices = @transform_2, window_bounds = array<i64: 1, 64>}, {pipeline_mode = #tpu.pipeline_mode<synchronous>, transform_indices = @transform_3, window_bounds = array<i64: 64, 16>}, {pipeline_mode = #tpu.pipeline_mode<synchronous>, transform_indices = @transform_4, window_bounds = array<i64: 1, 16>}, {transform_indices = @transform_5, window_bounds = array<i64: 8, 16>}]} {
    %c0 = arith.constant 0 : index
    %c0_0 = arith.constant 0 : index
    %0 = vector.load %arg1[%c0, %c0_0] : memref<8x32xf32, #tpu.memory_space<vmem>>, vector<8x32xf32>
    %c0_1 = arith.constant 0 : index
    %c0_2 = arith.constant 0 : index
    %1 = vector.load %arg2[%c0_1, %c0_2] : memref<32x64xf32, #tpu.memory_space<vmem>>, vector<32x64xf32>
    %cst = arith.constant dense<0.000000e+00> : vector<8x64xf32>
    %2 = tpu.matmul %0, %1, %cst {dimension_numbers = #tpu.dot_dimension_numbers<[1], [0], [0], [1], [0, 0, 1, 1], [], []>} : vector<8x32xf32>, vector<32x64xf32>, vector<8x64xf32> -> vector<8x64xf32>
    %c0_3 = arith.constant 0 : index
    %c0_4 = arith.constant 0 : index
    %3 = vector.load %arg3[%c0_3, %c0_4] : memref<1x64xf32, #tpu.memory_space<vmem>>, vector<1x64xf32>
    %4 = vector.broadcast %3 : vector<1x64xf32> to vector<8x64xf32>
    %5 = arith.addf %2, %4 : vector<8x64xf32>
    %cst_5 = arith.constant 0.000000e+00 : f32
    %6 = vector.broadcast %cst_5 : f32 to vector<8x64xf32>
    %7 = arith.maximumf %5, %6 : vector<8x64xf32>
    %c0_6 = arith.constant 0 : index
    %c0_7 = arith.constant 0 : index
    %8 = vector.load %arg4[%c0_6, %c0_7] : memref<64x16xf32, #tpu.memory_space<vmem>>, vector<64x16xf32>
    %cst_8 = arith.constant dense<0.000000e+00> : vector<8x16xf32>
    %9 = tpu.matmul %7, %8, %cst_8 {dimension_numbers = #tpu.dot_dimension_numbers<[1], [0], [0], [1], [0, 0, 1, 1], [], []>} : vector<8x64xf32>, vector<64x16xf32>, vector<8x16xf32> -> vector<8x16xf32>
    %c0_9 = arith.constant 0 : index
    %c0_10 = arith.constant 0 : index
    %10 = vector.load %arg5[%c0_9, %c0_10] : memref<1x16xf32, #tpu.memory_space<vmem>>, vector<1x16xf32>
    %11 = vector.broadcast %10 : vector<1x16xf32> to vector<8x16xf32>
    %12 = arith.addf %9, %11 : vector<8x16xf32>
    %c0_11 = arith.constant 0 : index
    %c0_12 = arith.constant 0 : index
    %13 = vector.load %arg6[%c0_11, %c0_12] : memref<8x16xf32, #tpu.memory_space<vmem>>, vector<8x16xf32>
    tpu.vector_store %arg6[%c0_11, %c0_12], %12 {strides = array<i32>} : memref<8x16xf32, #tpu.memory_space<vmem>>, vector<8x16xf32>,
    return
  }
  func.func @transform_0(%arg0: i32) -> (i32, i32) {
    %c0_i32 = arith.constant 0 : i32
    %c0_i32_0 = arith.constant 0 : i32
    return %arg0, %c0_i32 : i32, i32
  }
  func.func @transform_1(%arg0: i32) -> (i32, i32) {
    %c0_i32 = arith.constant 0 : i32
    %c0_i32_0 = arith.constant 0 : i32
    %c0_i32_1 = arith.constant 0 : i32
    return %c0_i32, %c0_i32_0 : i32, i32
  }
  func.func @transform_2(%arg0: i32) -> (i32, i32) {
    %c0_i32 = arith.constant 0 : i32
    %c0_i32_0 = arith.constant 0 : i32
    %c0_i32_1 = arith.constant 0 : i32
    return %c0_i32, %c0_i32_0 : i32, i32
  }
  func.func @transform_3(%arg0: i32) -> (i32, i32) {
    %c0_i32 = arith.constant 0 : i32
    %c0_i32_0 = arith.constant 0 : i32
    %c0_i32_1 = arith.constant 0 : i32
    return %c0_i32, %c0_i32_0 : i32, i32
  }
  func.func @transform_4(%arg0: i32) -> (i32, i32) {
    %c0_i32 = arith.constant 0 : i32
    %c0_i32_0 = arith.constant 0 : i32
    %c0_i32_1 = arith.constant 0 : i32
    return %c0_i32, %c0_i32_0 : i32, i32
  }
  func.func @transform_5(%arg0: i32) -> (i32, i32) {
    %c0_i32 = arith.constant 0 : i32
    %c0_i32_0 = arith.constant 0 : i32
    return %arg0, %c0_i32 : i32, i32
  }
}

</mosaic_0001>

<bundles_post_ra>
// kernel: proj_head.1
= control target key start
LH: loop header
LB: loop body
LE: loop exit
PB: predicated region body
PF: predicated region fallthrough
CT: control target
= control target key end

     0   :  { %v307_v3 = vmov 0.0|0.0   ;;  %vm308_vm0 = vmmov 0   ;;  %v309_v6 = vmov 0.0   ;;  %s398_s0 = inlined_call_operand.vmem [shape: f32[8,32], index: 0, kind: input, shape index: {}]   ;;  %s399_s1 = inlined_call_operand.vmem [shape: f32[32,64], index: 1, kind: input, shape index: {}]   ;;  %s400_s2 = inlined_call_operand.vmem [shape: f32[1,64], index: 2, kind: input, shape index: {}]   ;;  %s401_s3 = inlined_call_operand.vmem [shape: f32[64,16], index: 3, kind: input, shape index: {}]   ;;  %s402_s4 = inlined_call_operand.vmem [shape: f32[1,16], index: 4, kind: input, shape index: {}]   ;;  %s403_s5 = inlined_call_operand.hbm [shape: f32[8,16], index: 5, kind: output, shape index: {}]  }
   0x1   :  { %v22_v0 = vld [vmem:[%s399_s1] sm:$0xff]  ;;  %v23_v1 = vld [vmem:[%s399_s1 + $0x8] sm:$0xff]  ;;  %v24_v2 = vld [vmem:[%s399_s1 + $0x10] sm:$0xff]  ;;  %261 = vmatprep.subr.bf16.mxu0 %v307_v3  ;;  %239 = vmatprep.mubr.msk.f32.mxu0 %vm308_vm0, %v309_v6 }
   0x2   :  { %v262_v4 = vpack.c.bf16 %v23_v1, %v22_v0  ;;  %v25_v5 = vld [vmem:[%s399_s1 + $0x18] sm:$0xff]  ;;  %v108_v7 = vld [vmem:[%s401_s3] sm:$0xff]  ;;  %267 = vmatprep.subr.bf16.mxu1 %v307_v3  ;;  %v109_v8 = vld [vmem:[%s401_s3 + $0x8] sm:$0xff]  ;;  %258 = vmatprep.mubr.msk.f32.mxu1 %vm308_vm0, %v309_v6 }
   0x3   :  { %v110_v9 = vld [vmem:[%s401_s3 + $0x10] sm:$0xff]  ;;  %v111_v10 = vld [vmem:[%s401_s3 + $0x18] sm:$0xff]  ;;  %v265_v11 = vpack.c.bf16 %v25_v5, %v24_v2  ;;  %v268_v12 = vpack.c.bf16 %v109_v8, %v108_v7 }
   0x4   :  { %263 = vmatpush3.bf16.msra.mxu0 %v262_v4 }
   0x5   :  { %264 = vmatprep.subr.bf16.mxu0 %v307_v3 }
   0x6   :  { %10 = vsyncpa [#allocation3], 0  ;;  %269 = vmatpush3.bf16.msra.mxu1 %v268_v12  ;;  %v271_v13 = vpack.c.bf16 %v111_v10, %v110_v9  ;;  %v112_v14 = vld [vmem:[%s401_s3 + $0x20] sm:$0xff]  ;;  %v113_v15 = vld [vmem:[%s401_s3 + $0x28] sm:$0xff]  ;;  %vm33_vm1 = vcmask 261120   ;;  %vm123_vm2 = vcmask 523264  }
   0x7   :  { %270 = vmatprep.subr.bf16.mxu1 %v307_v3  ;;  %v21_v16 = vld [vmem:[%s398_s0] sm:$0xff]  ;;  %v274_v17 = vpack.c.bf16 %v113_v15, %v112_v14  ;;  %v114_v18 = vld [vmem:[%s401_s3 + $0x30] sm:$0xff]  ;;  %v115_v19 = vld [vmem:[%s401_s3 + $0x38] sm:$0xff]  ;;  %s310_s21 = smov [#allocation2]   ;;  %vm197_vm3 = vcmask 130048  }
   0x8   :  { %266 = vmatpush3.bf16.msra.mxu0 %v265_v11  ;;  %v277_v20 = vpack.c.bf16 %v115_v19, %v114_v18  ;;  %v213_v21 = vld [vmem:[%s400_s2] ss:$0 sm:$0xff]  ;;  %s205_s22 = sshll.u32 %s310_s21, 4  ;;  %s206_s22 = int_to_ptr.vmem [resolvable:$true] %s205_s22 }
   0x9   :  { %v215_v26 = vld [vmem:[%s402_s4] ss:$0 sm:$0xff]  ;;  %s283_s3 = scalar_lea.vmem %s206_s22, 128  ;;  %p288_p1 = scmp.lt.s32.totalorder %s206_s22, %s206_s22 }
   0xa   :  { %272 = vmatpush3.bf16.msra.mxu1 %v271_v13  ;;  %p284_p0 = scmp.ne.s32.totalorder %s206_s22, %s283_s3  ;;  %p289_p2 = scmp.lt.s32.totalorder %s283_s3, %s283_s3 }
   0xb   :  { %240 = vmatmul.mubr.msk.f32.vlgmr.msra.gmra.mrb[0].mxu0 %vm33_vm1, %v21_v16  ;;  %273 = vmatprep.subr.bf16.mxu1 %v307_v3 }
   0xc   :  { %p290_p3 = por %p289_p2, %p288_p1 }
   0xe   :  { %275 = vmatpush3.bf16.msra.mxu1 %v274_v17  ;;  %p291_p4 = pnand %p290_p3, %p284_p0 }
   0xf   :  { %276 = vmatprep.subr.bf16.mxu1 %v307_v3 }
  0x12   :  { %278 = vmatpush3.bf16.msra.mxu1 %v277_v20 }
  0xde   :  { %v103_v22 = vpop.f32.mrb[0].mxu0 }
  0xdf   :  { %v104_v23 = vadd.f32 %v213_v21, %v103_v22  ;;  %v241_v24 = vpop.f32.mrb[1].mxu0 }
  0xe1   :  { %v107_v25 = vmax.f32 %v104_v23, 0.0 }
  0xe3   :  { %259 = vmatmul.mubr.msk.f32.vlgmr.msra.gmra.mrb[0].mxu1 %vm123_vm2, %v107_v25 }
 0x1b6   :  { %v193_v27 = vpop.f32.mrb[0].mxu1 }
 0x1b7   :  { %v194_v28 = vadd.f32 %v215_v26, %v193_v27  ;;  %v260_v29 = vpop.f32.mrb[1].mxu1 }
 0x1b9   :  { %198 = vst.msk [vmem:[#allocation2] sm:$0xff] %vm197_vm3, %v194_v28 }
 0x1ba   :  { %294 = shalt.err (!%p291_p4)
}
 0x1bb   :  { %s295_s24 = scalar_lea.hbm %s403_s5, 128 }
 0x1bc   :  { %p296_p5 = scmp.ne.s32.totalorder %s403_s5, %s295_s24  ;;  %p299_p6 = scmp.lt.u32.totalorder %s295_s24, %s403_s5 }
 0x1be   :  { %p301_p7 = pnand %p299_p6, %p296_p5 }
 0x1c0   :  { %304 = shalt.err (!%p301_p7)
}
 0x1c1   :  { %208 = dma.vmem_to_hbm [thread:$0]  %s206_s22, 128, %s403_s5, [#allocation3]  }
 0x1c2   :  { %305 = dma.done.wait [#allocation3], 128  }
 0x1c3   :  { %306 = vsyncadd [#allocation3], 4294967168 }
 0x1c4   :  { %212 = vsyncpa [#allocation3], 1 }

</bundles_post_ra>
